<compile_context>
chip_gen: v6e
topology: v6e:2x2x1
jax: 0.10.0
libtpu: 0.0.40
codegen_flags: <defaults>
</compile_context>

<pallas_src>
import jax
import jax.numpy as jnp
from jax.experimental import pallas as pl
from jax.experimental.pallas import tpu as pltpu


def _fused_linear_relu_kernel(x_ref, w_ref, b_ref, o_ref):
    # One MXU matmul over the concatenated [F, P+V] weights, f32 accumulate,
    # single bias-add + ReLU epilogue, single cast + lane-dense store.
    acc = jnp.dot(x_ref[...], w_ref[...], preferred_element_type=jnp.float32)
    acc = acc + b_ref[...]                      # broadcast [1, P+V]
    o_ref[...] = jnp.maximum(acc, 0.0).astype(o_ref.dtype)


def fuse_params(w_pi, b_pi, w_vf, b_vf):
    """Concatenate policy/value params once.

    Do this once per parameter update (or store fused params as canonical),
    not inside every forward call.
    """
    w = jnp.concatenate([w_pi, w_vf], axis=1)                 # [F, P+V]
    b = jnp.concatenate([b_pi, b_vf], axis=0).reshape(1, -1)  # [1, P+V]
    return w, b


def _select_batch_tile(B):
    """Pick the batch tile (rows per grid step).

    - B <= 256: one full-array block (block dim == array dim is always legal,
      regardless of dtype sublane alignment).
    - B  > 256: multiple of 256 rows, >= 2 grid steps (v7x: one per
      TensorCore), capped at 2048 rows so the double-buffered x/out blocks
      (~4 MiB) stay far below every generation's default scoped-VMEM limit
      (v5e: 16 MiB).
    """
    if B <= 256:
        return B
    half = -(-B // 2)                  # ceil(B / 2) -> guarantees >= 2 steps
    tb = (half // 256) * 256           # round down to a multiple of 256
    return max(256, min(2048, tb))


def custom_network_forward_fused(features, w, b, *, use_bf16=False):
    """Fused head: returns relu(features @ W + b) with shape [B, P+V].

    Policy columns come first ([:, :P]), value columns second ([:, P:]).
    Prefer consuming this fused tensor and slicing lazily inside a jit region.
    """
    B, F = features.shape
    O = w.shape[1]
    out_dtype = features.dtype

    x = features
    if use_bf16:
        x = x.astype(jnp.bfloat16)
        w = w.astype(jnp.bfloat16)

    TB = _select_batch_tile(B)
    grid = (pl.cdiv(B, TB),)           # ragged last block handled by Pallas
                                       # masked stores; no wrapper-side pad.

    cost = pl.CostEstimate(
        flops=2 * B * F * O,
        transcendentals=0,
        bytes_accessed=(x.size * x.dtype.itemsize
                        + w.size * w.dtype.itemsize
                        + b.size * b.dtype.itemsize
                        + B * O * jnp.dtype(out_dtype).itemsize),
    )

    return pl.pallas_call(
        _fused_linear_relu_kernel,
        out_shape=jax.ShapeDtypeStruct((B, O), out_dtype),
        grid=grid,
        in_specs=[
            pl.BlockSpec((TB, F), lambda i: (i, 0)),   # x: tiled over batch
            pl.BlockSpec((F, O), lambda i: (0, 0)),    # W: grid-invariant, VMEM-resident
            pl.BlockSpec((1, O), lambda i: (0, 0)),    # b: grid-invariant, VMEM-resident
        ],
        out_specs=pl.BlockSpec((TB, O), lambda i: (i, 0)),
        compiler_params=pltpu.CompilerParams(
            dimension_semantics=("parallel",),          # batch axis -> both TCs on v7x
        ),
        cost_estimate=cost,
    )(x, w, b)


def custom_network_forward(features, w_pi, b_pi, w_vf, b_vf, *,
                           min_pallas_batch=33, use_bf16=False):
    """features: [B, F]; w_pi: [F, P]; b_pi: [P]; w_vf: [F, V]; b_vf: [V].

    Returns (latent_pi [B, P], latent_vf [B, V]) — same semantics as the
    PyTorch CustomNetwork.forward.
    """
    B, _ = features.shape
    P = w_pi.shape[1]
    V = w_vf.shape[1]

    if B < min_pallas_batch:
        # Tiny rollout/inference batches: the Pallas call is pure fixed
        # overhead here; plain jnp lets XLA fuse the head into the upstream
        # feature extractor.
        pi = jnp.maximum(features @ w_pi + b_pi, 0.0)
        vf = jnp.maximum(features @ w_vf + b_vf, 0.0)
        return pi, vf

    # NOTE: for peak throughput, call fuse_params() once per parameter update
    # and feed custom_network_forward_fused() directly; done here per-call
    # only to keep the module-compatible API self-contained.
    w, b = fuse_params(w_pi, b_pi, w_vf, b_vf)
    out = custom_network_forward_fused(features, w, b, use_bf16=use_bf16)

    # Splitting into two arrays is required by the module's (pi, vf) API;
    # when this whole function is inside the consumer's jit region XLA fuses
    # these slices into the next op instead of materializing copies.
    return out[:, :P], out[:, P:P + V]


def _ref_forward(features, w_pi, b_pi, w_vf, b_vf):
    pi = jnp.maximum(features @ w_pi + b_pi, 0.0)
    vf = jnp.maximum(features @ w_vf + b_vf, 0.0)
    return pi, vf


if __name__ == "__main__":
    # Module hyperparameters (small, consistent with the forward pass).
    feature_dim = 32
    last_layer_dim_pi = 64
    last_layer_dim_vf = 64
    batch = 2

    key = jax.random.PRNGKey(0)
    k_x, k_wp, k_bp, k_wv, k_bv = jax.random.split(key, 5)

    features = jax.random.normal(k_x, (batch, feature_dim), dtype=jnp.float32)

    # Deterministic parameter init (uniform, like PyTorch's default Linear
    # init scale 1/sqrt(fan_in)) — synthetic weights, no checkpoint load.
    bound = 1.0 / jnp.sqrt(feature_dim)
    w_pi = jax.random.uniform(k_wp, (feature_dim, last_layer_dim_pi),
                              minval=-bound, maxval=bound, dtype=jnp.float32)
    b_pi = jax.random.uniform(k_bp, (last_layer_dim_pi,),
                              minval=-bound, maxval=bound, dtype=jnp.float32)
    w_vf = jax.random.uniform(k_wv, (feature_dim, last_layer_dim_vf),
                              minval=-bound, maxval=bound, dtype=jnp.float32)
    b_vf = jax.random.uniform(k_bv, (last_layer_dim_vf,),
                              minval=-bound, maxval=bound, dtype=jnp.float32)

    # 1) Tiny batch, Pallas path forced (single full-array block, grid=(1,)).
    pi, vf = custom_network_forward(features, w_pi, b_pi, w_vf, b_vf,
                                    min_pallas_batch=0)
    jax.block_until_ready((pi, vf))
    pi_ref, vf_ref = _ref_forward(features, w_pi, b_pi, w_vf, b_vf)
    assert pi.shape == (batch, last_layer_dim_pi)
    assert vf.shape == (batch, last_layer_dim_vf)
    assert jnp.allclose(pi, pi_ref, atol=1e-5, rtol=1e-5)
    assert jnp.allclose(vf, vf_ref, atol=1e-5, rtol=1e-5)

    # 2) Tiny batch, default dispatch (plain jnp fallback path).
    pi_d, vf_d = custom_network_forward(features, w_pi, b_pi, w_vf, b_vf)
    jax.block_until_ready((pi_d, vf_d))
    assert jnp.allclose(pi_d, pi_ref, atol=1e-5, rtol=1e-5)
    assert jnp.allclose(vf_d, vf_ref, atol=1e-5, rtol=1e-5)

    # 3) PPO-minibatch batch: gridded Pallas path (TB=256 x 2 grid steps,
    #    "parallel" batch axis -> both TensorCores on v7x).
    big_batch = 512
    feats_big = jax.random.normal(jax.random.fold_in(k_x, 1),
                                  (big_batch, feature_dim), dtype=jnp.float32)
    pi_b, vf_b = custom_network_forward(feats_big, w_pi, b_pi, w_vf, b_vf)
    jax.block_until_ready((pi_b, vf_b))
    pi_br, vf_br = _ref_forward(feats_big, w_pi, b_pi, w_vf, b_vf)
    assert jnp.allclose(pi_b, pi_br, atol=1e-5, rtol=1e-5)
    assert jnp.allclose(vf_b, vf_br, atol=1e-5, rtol=1e-5)

    # 4) Non-divisible batch: no wrapper pad; the ragged final block (128
    #    valid rows of a 256-row tile) is handled by Pallas masked stores.
    ragged_batch = 640
    feats_rag = jax.random.normal(jax.random.fold_in(k_x, 2),
                                  (ragged_batch, feature_dim), dtype=jnp.float32)
    pi_r, vf_r = custom_network_forward(feats_rag, w_pi, b_pi, w_vf, b_vf)
    jax.block_until_ready((pi_r, vf_r))
    pi_rr, vf_rr = _ref_forward(feats_rag, w_pi, b_pi, w_vf, b_vf)
    assert pi_r.shape == (ragged_batch, last_layer_dim_pi)
    assert jnp.allclose(pi_r, pi_rr, atol=1e-5, rtol=1e-5)
    assert jnp.allclose(vf_r, vf_rr, atol=1e-5, rtol=1e-5)

    # 5) Optional bf16-input path (f32 accumulate), loose tolerance.
    pi_h, vf_h = custom_network_forward(feats_big, w_pi, b_pi, w_vf, b_vf,
                                        use_bf16=True)
    jax.block_until_ready((pi_h, vf_h))
    assert jnp.allclose(pi_h, pi_br, atol=5e-2, rtol=5e-2)
    assert jnp.allclose(vf_h, vf_br, atol=5e-2, rtol=5e-2)

    print("KERNEL_OK")
</pallas_src>

<mosaic_0001>
module attributes {stable_mosaic.version = 11 : i64} {
  func.func @_fused_linear_relu_kernel(%arg0: i32, %arg1: memref<2x32xf32, #tpu.memory_space<vmem>>, %arg2: memref<32x128xf32, #tpu.memory_space<vmem>>, %arg3: memref<1x128xf32, #tpu.memory_space<vmem>>, %arg4: memref<2x128xf32, #tpu.memory_space<vmem>>) attributes {dimension_semantics = [#tpu.dimension_semantics<parallel>], iteration_bounds = array<i64: 1>, scalar_prefetch = 0 : i64, scratch_operands = 0 : i64, tpu.core_type = #tpu.core_type<tc>, window_params = [{transform_indices = @transform_0, window_bounds = array<i64: 2, 32>}, {pipeline_mode = #tpu.pipeline_mode<synchronous>, transform_indices = @transform_1, window_bounds = array<i64: 32, 128>}, {pipeline_mode = #tpu.pipeline_mode<synchronous>, transform_indices = @transform_2, window_bounds = array<i64: 1, 128>}, {transform_indices = @transform_3, window_bounds = array<i64: 2, 128>}]} {
    %c0 = arith.constant 0 : index
    %c0_0 = arith.constant 0 : index
    %0 = vector.load %arg1[%c0, %c0_0] : memref<2x32xf32, #tpu.memory_space<vmem>>, vector<2x32xf32>
    %c0_1 = arith.constant 0 : index
    %c0_2 = arith.constant 0 : index
    %1 = vector.load %arg2[%c0_1, %c0_2] : memref<32x128xf32, #tpu.memory_space<vmem>>, vector<32x128xf32>
    %cst = arith.constant dense<0.000000e+00> : vector<2x128xf32>
    %2 = tpu.matmul %0, %1, %cst {dimension_numbers = #tpu.dot_dimension_numbers<[1], [0], [0], [1], [0, 0, 1, 1], [], []>} : vector<2x32xf32>, vector<32x128xf32>, vector<2x128xf32> -> vector<2x128xf32>
    %c0_3 = arith.constant 0 : index
    %c0_4 = arith.constant 0 : index
    %3 = vector.load %arg3[%c0_3, %c0_4] : memref<1x128xf32, #tpu.memory_space<vmem>>, vector<1x128xf32>
    %4 = vector.broadcast %3 : vector<1x128xf32> to vector<2x128xf32>
    %5 = arith.addf %2, %4 : vector<2x128xf32>
    %cst_5 = arith.constant 0.000000e+00 : f32
    %6 = vector.broadcast %cst_5 : f32 to vector<2x128xf32>
    %7 = arith.maximumf %5, %6 : vector<2x128xf32>
    %c0_6 = arith.constant 0 : index
    %c0_7 = arith.constant 0 : index
    %8 = vector.load %arg4[%c0_6, %c0_7] : memref<2x128xf32, #tpu.memory_space<vmem>>, vector<2x128xf32>
    tpu.vector_store %arg4[%c0_6, %c0_7], %7 {strides = array<i32>} : memref<2x128xf32, #tpu.memory_space<vmem>>, vector<2x128xf32>,
    return
  }
  func.func @transform_0(%arg0: i32) -> (i32, i32) {
    %c0_i32 = arith.constant 0 : i32
    %c0_i32_0 = arith.constant 0 : i32
    return %arg0, %c0_i32 : i32, i32
  }
  func.func @transform_1(%arg0: i32) -> (i32, i32) {
    %c0_i32 = arith.constant 0 : i32
    %c0_i32_0 = arith.constant 0 : i32
    %c0_i32_1 = arith.constant 0 : i32
    return %c0_i32, %c0_i32_0 : i32, i32
  }
  func.func @transform_2(%arg0: i32) -> (i32, i32) {
    %c0_i32 = arith.constant 0 : i32
    %c0_i32_0 = arith.constant 0 : i32
    %c0_i32_1 = arith.constant 0 : i32
    return %c0_i32, %c0_i32_0 : i32, i32
  }
  func.func @transform_3(%arg0: i32) -> (i32, i32) {
    %c0_i32 = arith.constant 0 : i32
    %c0_i32_0 = arith.constant 0 : i32
    return %arg0, %c0_i32 : i32, i32
  }
}

</mosaic_0001>

<bundles_post_ra>
// kernel: tpu_custom_call.1
= control target key start
LH: loop header
LB: loop body
LE: loop exit
PB: predicated region body
PF: predicated region fallthrough
CT: control target
= control target key end

     0   :  { %8 = vsyncpa [#allocation3], 0  ;;  %s275_s0 = inlined_call_operand.hbm [shape: f32[2,32], index: 0, kind: input, shape index: {}]   ;;  %s276_s1 = inlined_call_operand.hbm [shape: f32[32,128], index: 1, kind: input, shape index: {}]   ;;  %s277_s2 = inlined_call_operand.vmem [shape: f32[1,128], index: 2, kind: input, shape index: {}]   ;;  %s278_s3 = inlined_call_operand.hbm [shape: f32[2,128], index: 3, kind: output, shape index: {}]  }
   0x1   :  { %9 = vsyncpa [#allocation6], 0 }
   0x2   :  { %10 = vsyncpa [#allocation4], 0  ;;  %s236_s12 = smov [#allocation2]   ;;  %s237_s14 = smov [#allocation5]  }
   0x3   :  { %s17_s13 = sshll.u32 %s236_s12, 4  ;;  %s26_s15 = sshll.u32 %s237_s14, 4  ;;  %s18_s13 = int_to_ptr.vmem [resolvable:$true] %s17_s13  ;;  %s27_s15 = int_to_ptr.vmem [resolvable:$true] %s26_s15 }
   0x4   :  { %s178_s16 = scalar_lea.vmem %s18_s13, 32  ;;  %p183_p1 = scmp.lt.s32.totalorder %s18_s13, %s18_s13 }
   0x5   :  { %p179_p0 = scmp.ne.s32.totalorder %s18_s13, %s178_s16  ;;  %p184_p2 = scmp.lt.s32.totalorder %s178_s16, %s178_s16 }
   0x7   :  { %p185_p3 = por %p184_p2, %p183_p1 }
   0x9   :  { %p186_p4 = pnand %p185_p3, %p179_p0 }
   0xb   :  { %189 = shalt.err (!%p186_p4)
}
   0xc   :  { %20 = dma.hbm_to_vmem [thread:$0]  %s275_s0, 32, %s18_s13, [#allocation3]  }
   0xd   :  { %s198_s19 = scalar_lea.vmem %s27_s15, 512  ;;  %p203_p6 = scmp.lt.s32.totalorder %s27_s15, %s27_s15 }
   0xe   :  { %p199_p5 = scmp.ne.s32.totalorder %s27_s15, %s198_s19  ;;  %p204_p7 = scmp.lt.s32.totalorder %s198_s19, %s198_s19 }
  0x10   :  { %p205_p8 = por %p204_p7, %p203_p6 }
  0x12   :  { %p206_p9 = pnand %p205_p8, %p199_p5 }
  0x14   :  { %209 = shalt.err (!%p206_p9)
}
  0x15   :  { %s238_s20 = smov 128   ;;  %s239_s21 = smov 8  }
  0x16   :  { %32 = dma.hbm_to_vmem [thread:$0]  %s276_s1, 512, %s27_s15, [#allocation6], %s238_s20, %s238_s20, %s239_s21  }
  0x17   :  { %230 = dma.done.wait [#allocation3], 32  }
  0x18   :  { %231 = vsyncadd [#allocation3], 4294967264 }
  0x19   :  { %232 = dma.done.wait [#allocation6], 512  }
  0x1a   :  { %233 = vsyncadd [#allocation6], 4294966784  ;;  %v240_v0 = vmov 0.0   ;;  %vm241_vm0 = vmmov 0   ;;  %v45_v1 = vld [vmem:[#allocation5 + $0x18] sm:$0xff]  ;;  %v44_v2 = vld [vmem:[#allocation5 + $0x10] sm:$0xff] }
  0x1b   :  { %152 = vmatprep.subr.mxu0 %v240_v0  ;;  %160 = vmatprep.mubr.msk.f32.mxu0 %vm241_vm0, %v240_v0  ;;  %v43_v3 = vld [vmem:[#allocation5 + $0x8] sm:$0xff]  ;;  %v42_v4 = vld [vmem:[#allocation5] sm:$0xff]  ;;  %v41_v5 = vld [vmem:[#allocation2] sm:$0x3]  ;;  %vm53_vm1 = vcmask 261120   ;;  %s242_s24 = smov [#allocation7]  }
  0x1c   :  { %153 = vmatpush3.msra.mxu0 %v45_v1  ;;  %v145_v6 = vld [vmem:[%s277_s2] ss:$0 sm:$0xff]  ;;  %s135_s25 = sshll.u32 %s242_s24, 4  ;;  %s136_s25 = int_to_ptr.vmem [resolvable:$true] %s135_s25 }
  0x1d   :  { %154 = vmatprep.subr.mxu0 %v240_v0  ;;  %s210_s26 = scalar_lea.vmem %s136_s25, 32  ;;  %p215_p11 = scmp.lt.s32.totalorder %s136_s25, %s136_s25 }
  0x1e   :  { %155 = vmatpush3.msra.mxu0 %v44_v2  ;;  %p211_p10 = scmp.ne.s32.totalorder %s136_s25, %s210_s26  ;;  %p216_p12 = scmp.lt.s32.totalorder %s210_s26, %s210_s26 }
  0x1f   :  { %156 = vmatprep.subr.mxu0 %v240_v0 }
  0x20   :  { %157 = vmatpush3.msra.mxu0 %v43_v3  ;;  %p217_p13 = por %p216_p12, %p215_p11 }
  0x21   :  { %158 = vmatprep.subr.mxu0 %v240_v0 }
  0x22   :  { %159 = vmatpush3.msra.mxu0 %v42_v4  ;;  %p218_p0 = pnand %p217_p13, %p211_p10 }
  0x23   :  { %161 = vmatmul.mubr.msk.f32.vlgmr.msra.gmra.mxu0 %vm53_vm1, %v41_v5 }
  0xe3   :  { %v123_v7 = vpop.f32.mrf.mxu0 }
  0xe4   :  { %v124_v8 = vadd.f32 %v145_v6, %v123_v7 }
  0xe5   :  { %v162_v9 = vpop.f32.mrf.mxu0 }
  0xe6   :  { %v127_v10 = vmax.f32 %v124_v8, 0.0 }
  0xe8   :  { %128 = vst [vmem:[#allocation7] sm:$0x3] %v127_v10 }
  0xe9   :  { %221 = shalt.err (!%p218_p0)
}
  0xea   :  { %138 = dma.vmem_to_hbm [thread:$0]  %s136_s25, 32, %s278_s3, [#allocation4]  }
  0xeb   :  { %234 = dma.done.wait [#allocation4], 32  }
  0xec   :  { %235 = vsyncadd [#allocation4], 4294967264 }
  0xed   :  { %142 = vsyncpa [#allocation3], 1 }
  0xee   :  { %143 = vsyncpa [#allocation6], 1 }
  0xef   :  { %144 = vsyncpa [#allocation4], 1 }

</bundles_post_ra>
